<compile_context>
chip_gen: v5e
topology: v5e:2x2
jax: 0.10.0
libtpu: 0.0.40
codegen_flags: <defaults>
</compile_context>

<pallas_src>
import functools
import math

import jax
import jax.numpy as jnp
from jax.experimental import pallas as pl
from jax.experimental.pallas import tpu as pltpu


def _lanewise_grouped_softmax(x, internal_dim):
    """Grouped softmax on a (TILE_R, H) f32 tile, staying lane-dense.

    Requires internal_dim to be a power of two with H % internal_dim == 0.
    Per-group max / sum are XOR-butterfly all-reduces: the partner of lane i
    at step s is i ^ s, which always stays inside the same internal_dim-
    aligned group. Both roll directions are generated and the correct one is
    selected with a rolled lane-iota mask, so correctness does not depend on
    pltpu.roll's shift convention.
    """
    _, h = x.shape
    lane = jax.lax.broadcasted_iota(jnp.int32, (1, h), 1)

    shifts = []
    s = 1
    while s < internal_dim:
        shifts.append(s)
        s *= 2

    # mask[i] == True  ->  roll(v, h - s) holds v[i ^ s] at lane i.
    masks = []
    for s in shifts:
        lane_a = pltpu.roll(lane, h - s, axis=1)
        masks.append(lane_a == (lane ^ s))

    def seg_all_reduce(v, combine):
        out = v
        for s, sel in zip(shifts, masks):
            a = pltpu.roll(out, h - s, axis=1)
            b = pltpu.roll(out, s, axis=1)
            out = combine(out, jnp.where(sel, a, b))
        return out

    m = seg_all_reduce(x, jnp.maximum)             # per-group max (broadcast)
    e = jnp.exp(x - m)
    ssum = seg_all_reduce(e, lambda a, b: a + b)   # per-group sum (broadcast)
    return e * pl.reciprocal(ssum, approx=False)


def _grouped_softmax_kernel(x_ref, o_ref, *, internal_dim: int,
                            use_butterfly: bool):
    # x_ref / o_ref: (TILE_R, H) with H % internal_dim == 0.
    x = x_ref[...].astype(jnp.float32)
    tr, h = x.shape
    if use_butterfly:
        y = _lanewise_grouped_softmax(x, internal_dim)
    else:
        # Lane-dense when internal_dim % 128 == 0; otherwise this is the
        # (slower, relayout-heavy) fallback for non-power-of-two group sizes.
        groups = h // internal_dim
        xg = x.reshape(tr, groups, internal_dim)
        m = jnp.max(xg, axis=-1, keepdims=True)
        e = jnp.exp(xg - m)
        ssum = jnp.sum(e, axis=-1, keepdims=True)
        y = (e * pl.reciprocal(ssum, approx=False)).reshape(tr, h)
    o_ref[...] = y.astype(o_ref.dtype)


def _pick_tile_rows(rows, h, itemsize, target_block_bytes=2 << 20):
    """Largest ~target_block_bytes row tile; keep >= 2 grid steps when possible."""
    row_bytes = max(1, h * itemsize)
    t = max(8, (target_block_bytes // row_bytes) // 8 * 8)
    if rows <= t:
        if rows > 16:
            # Keep at least two grid steps so the "parallel" axis can shard
            # across TensorCores (v7x megacore); Pallas masks the tail block.
            half = (rows + 1) // 2
            return ((half + 7) // 8) * 8
        return rows
    return int(t)


def softmax_layer(x: jax.Array, internal_dim: int,
                  *, tile_rows: int | None = None) -> jax.Array:
    """Pallas equivalent of SoftmaxLayer(internal_dim).forward(x)."""
    orig_shape = x.shape
    h = orig_shape[-1]
    if internal_dim <= 0 or h % internal_dim != 0:
        raise ValueError("last dim must be divisible by internal_dim")

    # Glue: flatten leading dims to rows (lane-dense last axis).
    rows = math.prod(orig_shape[:-1])
    x2d = x.reshape(rows, h)

    itemsize = jnp.dtype(x.dtype).itemsize
    if tile_rows is None:
        tile_rows = _pick_tile_rows(rows, h, itemsize)
    grid = (pl.cdiv(rows, tile_rows),)

    is_pow2 = (internal_dim & (internal_dim - 1)) == 0
    use_butterfly = is_pow2 and internal_dim % 128 != 0

    kernel = functools.partial(
        _grouped_softmax_kernel,
        internal_dim=internal_dim,
        use_butterfly=use_butterfly,
    )

    out2d = pl.pallas_call(
        kernel,
        out_shape=jax.ShapeDtypeStruct((rows, h), x.dtype),
        grid_spec=pltpu.PrefetchScalarGridSpec(
            num_scalar_prefetch=0,
            grid=grid,
            in_specs=[pl.BlockSpec((tile_rows, h), lambda i: (i, 0))],
            out_specs=pl.BlockSpec((tile_rows, h), lambda i: (i, 0)),
        ),
        compiler_params=pltpu.CompilerParams(
            dimension_semantics=("parallel",),
            vmem_limit_bytes=32 * 1024 * 1024,
        ),
    )(x2d)

    return out2d.reshape(orig_shape)


def _reference(x: jax.Array, internal_dim: int) -> jax.Array:
    shape = x.shape
    xr = x.reshape(*shape[:-1], -1, internal_dim)
    yr = jax.nn.softmax(xr.astype(jnp.float32), axis=-1).astype(x.dtype)
    return yr.reshape(shape)


if __name__ == "__main__":
    key = jax.random.PRNGKey(0)
    k0, k1 = jax.random.split(key)

    # Small NCHW-like input: batch=2, channels=4, height=8, width=128.
    x = jax.random.normal(k0, (2, 4, 8, 128), dtype=jnp.float32)

    # Lane-dense XOR-butterfly path (internal_dim < 128, power of two).
    out = jax.block_until_ready(softmax_layer(x, 32))
    ref = _reference(x, 32)
    assert out.shape == x.shape and out.dtype == x.dtype
    assert jnp.allclose(out, ref, atol=1e-5, rtol=1e-5), "mismatch (id=32)"

    # Reshape path (internal_dim % 128 == 0).
    out128 = jax.block_until_ready(softmax_layer(x, 128))
    ref128 = _reference(x, 128)
    assert jnp.allclose(out128, ref128, atol=1e-5, rtol=1e-5), "mismatch (id=128)"

    # Row count not a multiple of the tile -> Pallas-masked tail block.
    y = jax.random.normal(k1, (3, 7, 256), dtype=jnp.float32)
    out_tail = jax.block_until_ready(softmax_layer(y, 64))
    ref_tail = _reference(y, 64)
    assert jnp.allclose(out_tail, ref_tail, atol=1e-5, rtol=1e-5), "mismatch (tail)"

    print("KERNEL_OK")
</pallas_src>

<mosaic_0001>
module attributes {stable_mosaic.version = 11 : i64} {
  func.func @_grouped_softmax_kernel(%arg0: i32, %arg1: memref<32x128xf32, #tpu.memory_space<vmem>>, %arg2: memref<32x128xf32, #tpu.memory_space<vmem>>) attributes {dimension_semantics = [#tpu.dimension_semantics<parallel>], iteration_bounds = array<i64: 2>, scalar_prefetch = 0 : i64, scratch_operands = 0 : i64, tpu.core_type = #tpu.core_type<tc>, window_params = [{transform_indices = @transform_0, window_bounds = array<i64: 32, 128>}, {transform_indices = @transform_1, window_bounds = array<i64: 32, 128>}]} {
    %c0 = arith.constant 0 : index
    %c0_0 = arith.constant 0 : index
    %0 = vector.load %arg1[%c0, %c0_0] : memref<32x128xf32, #tpu.memory_space<vmem>>, vector<32x128xf32>
    %1 = tpu.iota {dimensions = array<i32: 1>} : vector<1x128xi32>
    %c127_i32 = arith.constant 127 : i32
    %2 = tpu.dynamic_rotate %1 by %c127_i32 dim 1 : vector<1x128xi32>, i32 -> vector<1x128xi32>
    %c1_i32 = arith.constant 1 : i32
    %3 = vector.broadcast %c1_i32 : i32 to vector<1x128xi32>
    %4 = arith.xori %1, %3 : vector<1x128xi32>
    %5 = arith.cmpi eq, %2, %4 : vector<1x128xi32>
    %c126_i32 = arith.constant 126 : i32
    %6 = tpu.dynamic_rotate %1 by %c126_i32 dim 1 : vector<1x128xi32>, i32 -> vector<1x128xi32>
    %c2_i32 = arith.constant 2 : i32
    %7 = vector.broadcast %c2_i32 : i32 to vector<1x128xi32>
    %8 = arith.xori %1, %7 : vector<1x128xi32>
    %9 = arith.cmpi eq, %6, %8 : vector<1x128xi32>
    %c124_i32 = arith.constant 124 : i32
    %10 = tpu.dynamic_rotate %1 by %c124_i32 dim 1 : vector<1x128xi32>, i32 -> vector<1x128xi32>
    %c4_i32 = arith.constant 4 : i32
    %11 = vector.broadcast %c4_i32 : i32 to vector<1x128xi32>
    %12 = arith.xori %1, %11 : vector<1x128xi32>
    %13 = arith.cmpi eq, %10, %12 : vector<1x128xi32>
    %c120_i32 = arith.constant 120 : i32
    %14 = tpu.dynamic_rotate %1 by %c120_i32 dim 1 : vector<1x128xi32>, i32 -> vector<1x128xi32>
    %c8_i32 = arith.constant 8 : i32
    %15 = vector.broadcast %c8_i32 : i32 to vector<1x128xi32>
    %16 = arith.xori %1, %15 : vector<1x128xi32>
    %17 = arith.cmpi eq, %14, %16 : vector<1x128xi32>
    %c112_i32 = arith.constant 112 : i32
    %18 = tpu.dynamic_rotate %1 by %c112_i32 dim 1 : vector<1x128xi32>, i32 -> vector<1x128xi32>
    %c16_i32 = arith.constant 16 : i32
    %19 = vector.broadcast %c16_i32 : i32 to vector<1x128xi32>
    %20 = arith.xori %1, %19 : vector<1x128xi32>
    %21 = arith.cmpi eq, %18, %20 : vector<1x128xi32>
    %c127_i32_1 = arith.constant 127 : i32
    %22 = tpu.dynamic_rotate %0 by %c127_i32_1 dim 1 : vector<32x128xf32>, i32 -> vector<32x128xf32>
    %c1_i32_2 = arith.constant 1 : i32
    %23 = tpu.dynamic_rotate %0 by %c1_i32_2 dim 1 : vector<32x128xf32>, i32 -> vector<32x128xf32>
    %24 = vector.shape_cast %5 : vector<1x128xi1> to vector<1x128xi1>
    %25 = vector.broadcast %24 : vector<1x128xi1> to vector<32x128xi1>
    %26 = arith.select %25, %22, %23 : vector<32x128xi1>, vector<32x128xf32>
    %27 = arith.maximumf %0, %26 : vector<32x128xf32>
    %c126_i32_3 = arith.constant 126 : i32
    %28 = tpu.dynamic_rotate %27 by %c126_i32_3 dim 1 : vector<32x128xf32>, i32 -> vector<32x128xf32>
    %c2_i32_4 = arith.constant 2 : i32
    %29 = tpu.dynamic_rotate %27 by %c2_i32_4 dim 1 : vector<32x128xf32>, i32 -> vector<32x128xf32>
    %30 = vector.shape_cast %9 : vector<1x128xi1> to vector<1x128xi1>
    %31 = vector.broadcast %30 : vector<1x128xi1> to vector<32x128xi1>
    %32 = arith.select %31, %28, %29 : vector<32x128xi1>, vector<32x128xf32>
    %33 = arith.maximumf %27, %32 : vector<32x128xf32>
    %c124_i32_5 = arith.constant 124 : i32
    %34 = tpu.dynamic_rotate %33 by %c124_i32_5 dim 1 : vector<32x128xf32>, i32 -> vector<32x128xf32>
    %c4_i32_6 = arith.constant 4 : i32
    %35 = tpu.dynamic_rotate %33 by %c4_i32_6 dim 1 : vector<32x128xf32>, i32 -> vector<32x128xf32>
    %36 = vector.shape_cast %13 : vector<1x128xi1> to vector<1x128xi1>
    %37 = vector.broadcast %36 : vector<1x128xi1> to vector<32x128xi1>
    %38 = arith.select %37, %34, %35 : vector<32x128xi1>, vector<32x128xf32>
    %39 = arith.maximumf %33, %38 : vector<32x128xf32>
    %c120_i32_7 = arith.constant 120 : i32
    %40 = tpu.dynamic_rotate %39 by %c120_i32_7 dim 1 : vector<32x128xf32>, i32 -> vector<32x128xf32>
    %c8_i32_8 = arith.constant 8 : i32
    %41 = tpu.dynamic_rotate %39 by %c8_i32_8 dim 1 : vector<32x128xf32>, i32 -> vector<32x128xf32>
    %42 = vector.shape_cast %17 : vector<1x128xi1> to vector<1x128xi1>
    %43 = vector.broadcast %42 : vector<1x128xi1> to vector<32x128xi1>
    %44 = arith.select %43, %40, %41 : vector<32x128xi1>, vector<32x128xf32>
    %45 = arith.maximumf %39, %44 : vector<32x128xf32>
    %c112_i32_9 = arith.constant 112 : i32
    %46 = tpu.dynamic_rotate %45 by %c112_i32_9 dim 1 : vector<32x128xf32>, i32 -> vector<32x128xf32>
    %c16_i32_10 = arith.constant 16 : i32
    %47 = tpu.dynamic_rotate %45 by %c16_i32_10 dim 1 : vector<32x128xf32>, i32 -> vector<32x128xf32>
    %48 = vector.shape_cast %21 : vector<1x128xi1> to vector<1x128xi1>
    %49 = vector.broadcast %48 : vector<1x128xi1> to vector<32x128xi1>
    %50 = arith.select %49, %46, %47 : vector<32x128xi1>, vector<32x128xf32>
    %51 = arith.maximumf %45, %50 : vector<32x128xf32>
    %52 = arith.subf %0, %51 : vector<32x128xf32>
    %53 = math.exp %52 : vector<32x128xf32>
    %c127_i32_11 = arith.constant 127 : i32
    %54 = tpu.dynamic_rotate %53 by %c127_i32_11 dim 1 : vector<32x128xf32>, i32 -> vector<32x128xf32>
    %c1_i32_12 = arith.constant 1 : i32
    %55 = tpu.dynamic_rotate %53 by %c1_i32_12 dim 1 : vector<32x128xf32>, i32 -> vector<32x128xf32>
    %56 = vector.shape_cast %5 : vector<1x128xi1> to vector<1x128xi1>
    %57 = vector.broadcast %56 : vector<1x128xi1> to vector<32x128xi1>
    %58 = arith.select %57, %54, %55 : vector<32x128xi1>, vector<32x128xf32>
    %59 = arith.addf %53, %58 : vector<32x128xf32>
    %c126_i32_13 = arith.constant 126 : i32
    %60 = tpu.dynamic_rotate %59 by %c126_i32_13 dim 1 : vector<32x128xf32>, i32 -> vector<32x128xf32>
    %c2_i32_14 = arith.constant 2 : i32
    %61 = tpu.dynamic_rotate %59 by %c2_i32_14 dim 1 : vector<32x128xf32>, i32 -> vector<32x128xf32>
    %62 = vector.shape_cast %9 : vector<1x128xi1> to vector<1x128xi1>
    %63 = vector.broadcast %62 : vector<1x128xi1> to vector<32x128xi1>
    %64 = arith.select %63, %60, %61 : vector<32x128xi1>, vector<32x128xf32>
    %65 = arith.addf %59, %64 : vector<32x128xf32>
    %c124_i32_15 = arith.constant 124 : i32
    %66 = tpu.dynamic_rotate %65 by %c124_i32_15 dim 1 : vector<32x128xf32>, i32 -> vector<32x128xf32>
    %c4_i32_16 = arith.constant 4 : i32
    %67 = tpu.dynamic_rotate %65 by %c4_i32_16 dim 1 : vector<32x128xf32>, i32 -> vector<32x128xf32>
    %68 = vector.shape_cast %13 : vector<1x128xi1> to vector<1x128xi1>
    %69 = vector.broadcast %68 : vector<1x128xi1> to vector<32x128xi1>
    %70 = arith.select %69, %66, %67 : vector<32x128xi1>, vector<32x128xf32>
    %71 = arith.addf %65, %70 : vector<32x128xf32>
    %c120_i32_17 = arith.constant 120 : i32
    %72 = tpu.dynamic_rotate %71 by %c120_i32_17 dim 1 : vector<32x128xf32>, i32 -> vector<32x128xf32>
    %c8_i32_18 = arith.constant 8 : i32
    %73 = tpu.dynamic_rotate %71 by %c8_i32_18 dim 1 : vector<32x128xf32>, i32 -> vector<32x128xf32>
    %74 = vector.shape_cast %17 : vector<1x128xi1> to vector<1x128xi1>
    %75 = vector.broadcast %74 : vector<1x128xi1> to vector<32x128xi1>
    %76 = arith.select %75, %72, %73 : vector<32x128xi1>, vector<32x128xf32>
    %77 = arith.addf %71, %76 : vector<32x128xf32>
    %c112_i32_19 = arith.constant 112 : i32
    %78 = tpu.dynamic_rotate %77 by %c112_i32_19 dim 1 : vector<32x128xf32>, i32 -> vector<32x128xf32>
    %c16_i32_20 = arith.constant 16 : i32
    %79 = tpu.dynamic_rotate %77 by %c16_i32_20 dim 1 : vector<32x128xf32>, i32 -> vector<32x128xf32>
    %80 = vector.shape_cast %21 : vector<1x128xi1> to vector<1x128xi1>
    %81 = vector.broadcast %80 : vector<1x128xi1> to vector<32x128xi1>
    %82 = arith.select %81, %78, %79 : vector<32x128xi1>, vector<32x128xf32>
    %83 = arith.addf %77, %82 : vector<32x128xf32>
    %84 = tpu.reciprocal %83 : vector<32x128xf32> -> vector<32x128xf32>
    %85 = arith.mulf %53, %84 : vector<32x128xf32>
    %c0_21 = arith.constant 0 : index
    %c0_22 = arith.constant 0 : index
    %86 = vector.load %arg2[%c0_21, %c0_22] : memref<32x128xf32, #tpu.memory_space<vmem>>, vector<32x128xf32>
    tpu.vector_store %arg2[%c0_21, %c0_22], %85 {strides = array<i32>} : memref<32x128xf32, #tpu.memory_space<vmem>>, vector<32x128xf32>,
    return
  }
  func.func @transform_0(%arg0: i32) -> (i32, i32) {
    %c0_i32 = arith.constant 0 : i32
    %c0_i32_0 = arith.constant 0 : i32
    return %arg0, %c0_i32 : i32, i32
  }
  func.func @transform_1(%arg0: i32) -> (i32, i32) {
    %c0_i32 = arith.constant 0 : i32
    %c0_i32_0 = arith.constant 0 : i32
    return %arg0, %c0_i32 : i32, i32
  }
}

</mosaic_0001>

<bundles_post_ra>
// kernel: tpu_custom_call.1
= control target key start
LH: loop header
LB: loop body
LE: loop exit
PB: predicated region body
PF: predicated region fallthrough
CT: control target
= control target key end

     0   :  { %6 = vsyncpa [#allocation3], 0  ;;  %s1188_s0 = inlined_call_operand.hbm [shape: f32[64,128], index: 0, kind: input, shape index: {}]   ;;  %s1189_s1 = inlined_call_operand.hbm [shape: f32[64,128], index: 1, kind: output, shape index: {}]  }
   0x1   :  { %8 = vsyncpa [#allocation3 + $0x1], 0 }
   0x2   :  { %9 = vsyncpa [#allocation4], 0 }
   0x3   :  { %11 = vsyncpa [#allocation4 + $0x1], 0  ;;  %s799_s6 = smov 0   ;;  %s801_s7 = smov 0  }
   0x4   :  { %s803_s8 = smov 0   ;;  %s805_s9 = smov 0  }
   0x5 LB: > { %s820_s10 = sadd.s32 4294967295, %s773_s9   ;;  %s585_s11 = sadd.s32 4294967294, %s773_s9   ;;  %s773_s9 = sphi %s805_s9, %s1209_s9   ;;  %s769_s8 = sphi %s803_s8, %s1208_s8   ;;  %s765_s7 = sphi %s801_s7, %s1207_s7   ;;  %s761_s6 = sphi %s799_s6, %s1206_s6  }
   0x6   : > { %s824_s12 = sadd.s32 1, %s773_s9   ;;  %s24_s13 = sadd.s32 1, %s769_s8 }
   0x7   : > { %s21_s14 = ssub.s32 %s773_s9, %s824_s12  ;;  %p31_p0 = scmp.ne.s32.totalorder %s769_s8, %s765_s7 }
   0x8   : > { %p22_p1 = scmp.eq.s32.totalorder %s21_s14, 0  ;;  %p32_p2 = scmp.eq.s32.totalorder %s773_s9, 0 }
   0x9   : > { %p37_p3 = scmp.ne.s32.totalorder %s765_s7, %s761_s6  ;;  %p38_p4 = scmp.eq.s32.totalorder %s820_s10, 0 }
   0xa   : > { %s836_s15 = scalar_select %p22_p1, %s769_s8, %s24_s13  }
   0xb   : > { %p838_p5 = por %p32_p2, %p31_p0  ;;  %p842_p6 = por %p38_p4, %p37_p3 }
   0xc   : > { %p61_p7 = scmp.eq.s32.totalorder %s820_s10, 1  ;;  %p67_p8 = scmp.eq.s32.totalorder %s585_s11, 1 }
   0xd   : > { %p613_p10 = scmp.lt.s32.totalorder %s773_s9, 2  ;;  %s87_s20 = sand.u32 1, %s769_s8  }
   0xe   : > { %p849_p11 = por %p61_p7, %p31_p0  ;;  %p853_p12 = por %p67_p8, %p37_p3 }
   0xf   : > { %s599_s21 = sshll.u32 %s773_s9, 5  ;;  %s588_s22 = sshll.u32 %s87_s20, 5 }
  0x10   : > { %s96_s25 = scalar_lea.hbm %s1188_s0, %s599_s21  ;;  %s91_s27 = scalar_lea.vmem [#allocation2], %s588_s22 }
  0x11   : > { %s97_s26 = sshll.u32 %s96_s25, 4  ;;  %s99_s28 = sshll.u32 %s91_s27, 4  ;;  %s98_s26 = int_to_ptr.hbm [resolvable:$true] %s97_s26  ;;  %s100_s28 = int_to_ptr.vmem [resolvable:$true] %s99_s28 }
  0x12   : > { %p864_p13 = pnand %p613_p10, %p838_p5  ;;  %p591_p0 = scmp.ge.s32.totalorder %s773_s9, 1 }
  0x13   : > { %p107_p1 = scmp.lt.s32.totalorder %s773_s9, 3  ;;  %s88_s30 = scalar_lea.sflag [#allocation3], %s87_s20 }
  0x14   : > { %s677_s2 = sshra.s32 %s98_s26, 4  ;;  %p681_p3 = pneg %p864_p13  ;;  %s678_s2 = int_to_ptr.hbm [resolvable:$true] %s677_s2 }
  0x15   : > { %s679_s3 = scalar_lea.hbm %s678_s2, 32  ;;  %s684_s11 = scalar_lea.hbm %s1188_s0, 64 }
  0x16   : > { %p680_p2 = scmp.ne.s32.totalorder %s678_s2, %s679_s3  ;;  %p685_p5 = scmp.lt.s32.totalorder %s678_s2, %s1188_s0 }
  0x17   : > { %p686_p8 = scmp.lt.s32.totalorder %s684_s11, %s679_s3 }
  0x18   : > { %p682_p4 = pnand %p681_p3, %p680_p2 }
  0x19   : > { %p687_p10 = por %p686_p8, %p685_p5 }
  0x1a   : > { %p683_p7 = pneg %p682_p4 }
  0x1c   : > { %p688_p9 = pnand %p687_p10, %p683_p7 }
  0x1e   : > { %691 = shalt.err (!%p688_p9)
}
  0x1f   : > { %s775_s16 = smov 128   ;;  %s776_s20 = smov 8  }
  0x20   : > { %608 = dma.hbm_to_vmem [thread:$0]  (!%p864_p13), %s98_s26, 512, %s100_s28, %s88_s30, %s775_s16, %s775_s16, %s776_s20  }
  0x21   : > { %p108_p2 = pnand %p591_p0, %p107_p1 }
  0x22   : > { %s885_s21 = sand.u32 (!%p108_p2), 1, %s765_s7  }
  0x23   : > { %111 = sbr.rel (%p108_p2) target bundleno = 1326 (0x52e), region = 24  ;;  %s592_s22 = sshll.u32 (!%p108_p2), %s885_s21, 5 }
  0x24   : > { %s114_s23 = scalar_lea.sflag (!%p108_p2), [#allocation3], %s885_s21  ;;  %s117_s24 = scalar_lea.vmem (!%p108_p2), [#allocation2], %s592_s22 }
  0x28   : > { %752 = dma.done.wait (%p842_p6), %s114_s23, 512  }
  0x29   : > { %754 = vsyncadd (%p842_p6), %s114_s23, 4294966784  ;;  %v143_v0 = vlaneseq  ;;  %s777_s25 = smov 127   ;;  %v899_v2 = vld [vmem:[%s117_s24 + $0x8] sm:$0xff]  ;;  %v903_v3 = vld [vmem:[%s117_s24 + $0x18] sm:$0xff]  ;;  %s778_s17 = smov 1   ;;  %v780_v10 = vmov 0  }
  0x2a   : > { %167 = vrot.lane.b32.xlu1 %v899_v2, %s777_s25  ;;  %v905_v4 = vld [vmem:[%s117_s24] sm:$0xff]  ;;  %171 = vrot.lane.b32.xlu2 %v903_v3, %s777_s25  ;;  %v911_v5 = vld [vmem:[%s117_s24 + $0x10] sm:$0xff]  ;;  %s779_s26 = smov 126   ;;  %s781_s27 = smov 2  }
  0x2b   : > { %v895_v1 = vand.u32 127, %v143_v0  ;;  %s782_s28 = smov 124   ;;  %s783_s29 = smov 4  }
  0x2c   : > { %s784_s30 = smov 120   ;;  %s785_s2 = smov 8  }
  0x2d   : > { %145 = vrot.lane.b32.xlu0 %v895_v1, %s777_s25  ;;  %v147_v7 = vxor.u32 1, %v895_v1  ;;  %v151_v28 = vxor.u32 2, %v895_v1  ;;  %v155_v49 = vxor.u32 4, %v895_v1  ;;  %s786_s3 = smov 112   ;;  %s787_s4 = smov 16  }
  0x2e   : > { %s1144_s5 = scalar_lea.vmem [#allocation5], %s592_s22  ;;  %s600_s11 = sshll.u32 %s820_s10, 5 }
  0x2f   : > { %s508_s16 = scalar_lea.hbm %s1189_s1, %s600_s11  ;;  %s509_s20 = sshll.u32 %s1144_s5, 4  ;;  %s510_s20 = int_to_ptr.vmem [resolvable:$true] %s509_s20 }
  0x30   : > { %s511_s10 = sshll.u32 %s508_s16, 4  ;;  %s497_s22 = scalar_lea.sflag [#allocation4], %s885_s21  ;;  %s512_s10 = int_to_ptr.hbm [resolvable:$true] %s511_s10 }
  0x31   : > { %s721_s23 = sshra.s32 %s512_s10, 4  ;;  %s722_s23 = int_to_ptr.hbm [resolvable:$true] %s721_s23 }
  0x32   : > { %169 = vrot.lane.b32.xlu1 %v911_v5, %s777_s25  ;;  %173 = vrot.lane.b32.xlu2 %v905_v4, %s778_s17  ;;  %s723_s24 = scalar_lea.hbm %s722_s23, 32  ;;  %p728_p0 = scmp.lt.s32.totalorder %s722_s23, %s1189_s1 }
  0x33   : > { %p724_p6 = scmp.ne.s32.totalorder %s722_s23, %s723_s24 }
  0x35   : > { %165 = vrot.lane.b32.xlu0 %v905_v4, %s777_s25  ;;  %p725_p9 = pnand %p724_p6, %p849_p11 }
  0x37   : > { %p726_p13 = pneg %p725_p9 }
  0x3a   : > { %177 = vrot.lane.b32.xlu1 %v911_v5, %s778_s17  ;;  %179 = vrot.lane.b32.xlu2 %v903_v3, %s778_s17 }
  0x3d   : > { %175 = vrot.lane.b32.xlu0 %v899_v2, %s778_s17 }
  0x45   : > { %149 = vrot.lane.b32.xlu0 %v895_v1, %s779_s26 }
  0x84   : > { %v172_v6 = vpop.permute.xlu2 %171 }
  0x8c   : > { %v174_v9 = vpop.permute.xlu2 %173 }
  0x94   : > { %v180_v18 = vpop.permute.xlu2 %179 }
  0x9c   : > { %v168_v13 = vpop.permute.xlu1 %167 }
  0x9f   : > { %v146_v8 = vpop.permute.xlu0 %145 }
  0xa0   : > { %vm148_vm0 = vcmp.eq.s32.totalorder %v146_v8, %v147_v7 }
  0xa1   : > { %v181_v11 = vsel %vm148_vm0, 1, %v780_v10 }
  0xa2   : > { %v182_v12 = vperm.slane %v181_v11, 0 }
  0xa4   : > { %vm927_vm1 = vcmp.eq.s32.totalorder %v182_v12, 1  ;;  %v170_v19 = vpop.permute.xlu1 %169  ;;  %v159_v12 = vxor.u32 8, %v895_v1 }
  0xa5   : > { %v187_v20 = vsel %vm927_vm1, %v172_v6, %v180_v18 }
  0xa6   : > { %v191_v23 = vmax.f32 %v903_v3, %v187_v20 }
  0xa7   : > { %v166_v15 = vpop.permute.xlu0 %165 }
  0xa8   : > { %v184_v16 = vsel %vm927_vm1, %v166_v15, %v174_v9 }
  0xa9   : > { %v188_v17 = vmax.f32 %v905_v4, %v184_v16 }
  0xab   : > { %192 = vrot.lane.b32.xlu1 %v188_v17, %s779_s26 }
  0xac   : > { %v178_v25 = vpop.permute.xlu1 %177 }
  0xad   : > { %v186_v26 = vsel %vm927_vm1, %v170_v19, %v178_v25 }
  0xae   : > { %v190_v27 = vmax.f32 %v911_v5, %v186_v26 }
  0xaf   : > { %v176_v21 = vpop.permute.xlu0 %175 }
  0xb0   : > { %v185_v22 = vsel %vm927_vm1, %v168_v13, %v176_v21  ;;  %196 = vrot.lane.b32.xlu0 %v190_v27, %s779_s26 }
  0xb1   : > { %v189_v24 = vmax.f32 %v899_v2, %v185_v22 }
  0xb3   : > { %198 = vrot.lane.b32.xlu1 %v191_v23, %s779_s26  ;;  %194 = vrot.lane.b32.xlu2 %v189_v24, %s779_s26 }
  0xb7   : > { %v150_v29 = vpop.permute.xlu0 %149 }
  0xb8   : > { %202 = vrot.lane.b32.xlu0 %v189_v24, %s781_s27  ;;  %vm152_vm2 = vcmp.eq.s32.totalorder %v150_v29, %v151_v28 }
  0xb9   : > { %v208_v31 = vsel %vm152_vm2, 1, %v780_v10 }
  0xba   : > { %v209_v32 = vperm.slane %v208_v31, 0 }
  0xbb   : > { %204 = vrot.lane.b32.xlu1 %v190_v27, %s781_s27  ;;  %200 = vrot.lane.b32.xlu2 %v188_v17, %s781_s27 }
  0xbc   : > { %vm955_vm3 = vcmp.eq.s32.totalorder %v209_v32, 1 }
  0xc0   : > { %153 = vrot.lane.b32.xlu0 %v895_v1, %s782_s28 }
  0xc3   : > { %206 = vrot.lane.b32.xlu2 %v191_v23, %s781_s27 }
 0x10d   : > { %v195_v30 = vpop.permute.xlu2 %194 }
 0x115   : > { %v201_v33 = vpop.permute.xlu2 %200 }
 0x11d   : > { %v193_v35 = vpop.permute.xlu1 %192  ;;  %v207_v38 = vpop.permute.xlu2 %206 }
 0x11e   : > { %v211_v36 = vsel %vm955_vm3, %v193_v35, %v201_v33  ;;  %v163_v35 = vxor.u32 16, %v895_v1 }
 0x11f   : > { %v215_v37 = vmax.f32 %v188_v17, %v211_v36 }
 0x121   : > { %219 = vrot.lane.b32.xlu1 %v215_v37, %s782_s28 }
 0x122   : > { %v197_v42 = vpop.permute.xlu0 %196 }
 0x125   : > { %v199_v39 = vpop.permute.xlu1 %198 }
 0x126   : > { %v214_v40 = vsel %vm955_vm3, %v199_v39, %v207_v38 }
 0x127   : > { %v218_v41 = vmax.f32 %v191_v23, %v214_v40 }
 0x129   : > { %225 = vrot.lane.b32.xlu1 %v218_v41, %s782_s28 }
 0x12a   : > { %v203_v46 = vpop.permute.xlu0 %202 }
 0x12b   : > { %v212_v47 = vsel %vm955_vm3, %v195_v30, %v203_v46 }
 0x12c   : > { %v216_v48 = vmax.f32 %v189_v24, %v212_v47 }
 0x12d   : > { %v205_v43 = vpop.permute.xlu1 %204 }
 0x12e   : > { %v213_v44 = vsel %vm955_vm3, %v197_v42, %v205_v43  ;;  %221 = vrot.lane.b32.xlu2 %v216_v48, %s782_s28 }
 0x12f   : > { %v217_v45 = vmax.f32 %v190_v27, %v213_v44 }
 0x131   : > { %231 = vrot.lane.b32.xlu1 %v217_v45, %s783_s29  ;;  %223 = vrot.lane.b32.xlu0 %v217_v45, %s782_s28 }
 0x132   : > { %v154_v50 = vpop.permute.xlu0 %153 }
 0x133   : > { %vm156_vm4 = vcmp.eq.s32.totalorder %v154_v50, %v155_v49 }
 0x134   : > { %v235_v51 = vsel %vm156_vm4, 1, %v780_v10 }
 0x135   : > { %v236_v53 = vperm.slane %v235_v51, 0 }
 0x136   : > { %227 = vrot.lane.b32.xlu2 %v215_v37, %s783_s29 }
 0x137   : > { %vm979_vm5 = vcmp.eq.s32.totalorder %v236_v53, 1 }
 0x139   : > { %229 = vrot.lane.b32.xlu0 %v216_v48, %s783_s29 }
 0x13e   : > { %233 = vrot.lane.b32.xlu2 %v218_v41, %s783_s29 }
 0x141   : > { %157 = vrot.lane.b32.xlu0 %v895_v1, %s784_s30 }
 0x188   : > { %v222_v52 = vpop.permute.xlu2 %221 }
 0x190   : > { %v228_v56 = vpop.permute.xlu2 %227 }
 0x193   : > { %v220_v54 = vpop.permute.xlu1 %219 }
 0x194   : > { %v238_v57 = vsel %vm979_vm5, %v220_v54, %v228_v56 }
 0x195   : > { %v242_v58 = vmax.f32 %v215_v37, %v238_v57 }
 0x197   : > { %246 = vrot.lane.b32.xlu1 %v242_v58, %s784_s30 }
 0x198   : > { %v234_v60 = vpop.permute.xlu2 %233 }
 0x19b   : > { %v226_v59 = vpop.permute.xlu1 %225 }
 0x19c   : > { %v241_v61 = vsel %vm979_vm5, %v226_v59, %v234_v60 }
 0x19d   : > { %v245_v62 = vmax.f32 %v218_v41, %v241_v61 }
 0x19f   : > { %252 = vrot.lane.b32.xlu1 %v245_v62, %s784_s30 }
 0x1a3   : > { %v232_v63 = vpop.permute.xlu1 %231  ;;  %v224_v0 = vpop.permute.xlu0 %223 }
 0x1a4   : > { %v240_v6 = vsel %vm979_vm5, %v224_v0, %v232_v63 }
 0x1a5   : > { %v244_v7 = vmax.f32 %v217_v45, %v240_v6 }
 0x1a7   : > { %250 = vrot.lane.b32.xlu0 %v244_v7, %s784_s30  ;;  %258 = vrot.lane.b32.xlu1 %v244_v7, %s785_s2 }
 0x1ab   : > { %v230_v8 = vpop.permute.xlu0 %229 }
 0x1ac   : > { %v239_v9 = vsel %vm979_vm5, %v222_v52, %v230_v8 }
 0x1ad   : > { %v243_v11 = vmax.f32 %v216_v48, %v239_v9 }
 0x1af   : > { %256 = vrot.lane.b32.xlu0 %v243_v11, %s785_s2  ;;  %248 = vrot.lane.b32.xlu2 %v243_v11, %s784_s30 }
 0x1b3   : > { %v158_v13 = vpop.permute.xlu0 %157 }
 0x1b4   : > { %vm160_vm6 = vcmp.eq.s32.totalorder %v158_v13, %v159_v12 }
 0x1b5   : > { %v262_v15 = vsel %vm160_vm6, 1, %v780_v10 }
 0x1b6   : > { %v263_v17 = vperm.slane %v262_v15, 0 }
 0x1b7   : > { %254 = vrot.lane.b32.xlu2 %v242_v58, %s785_s2  ;;  %161 = vrot.lane.b32.xlu0 %v895_v1, %s786_s3 }
 0x1b8   : > { %vm1003_vm7 = vcmp.eq.s32.totalorder %v263_v17, 1 }
 0x1bf   : > { %260 = vrot.lane.b32.xlu2 %v245_v62, %s785_s2 }
 0x209   : > { %v249_v16 = vpop.permute.xlu2 %248  ;;  %v247_v18 = vpop.permute.xlu1 %246 }
 0x211   : > { %v255_v20 = vpop.permute.xlu2 %254  ;;  %v253_v23 = vpop.permute.xlu1 %252 }
 0x212   : > { %v265_v21 = vsel %vm1003_vm7, %v247_v18, %v255_v20 }
 0x213   : > { %v269_v22 = vmax.f32 %v242_v58, %v265_v21 }
 0x215   : > { %273 = vrot.lane.b32.xlu1 %v269_v22, %s786_s3 }
 0x219   : > { %v261_v24 = vpop.permute.xlu2 %260  ;;  %v251_v25 = vpop.permute.xlu0 %250 }
 0x21a   : > { %v268_v26 = vsel %vm1003_vm7, %v253_v23, %v261_v24  ;;  %v259_v28 = vpop.permute.xlu1 %258 }
 0x21b   : > { %v272_v27 = vmax.f32 %v245_v62, %v268_v26  ;;  %v267_v29 = vsel %vm1003_vm7, %v251_v25, %v259_v28 }
 0x21c   : > { %v271_v30 = vmax.f32 %v244_v7, %v267_v29 }
 0x21d   : > { %279 = vrot.lane.b32.xlu1 %v272_v27, %s786_s3 }
 0x21e   : > { %277 = vrot.lane.b32.xlu0 %v271_v30, %s786_s3 }
 0x221   : > { %v257_v31 = vpop.permute.xlu0 %256 }
 0x222   : > { %v266_v32 = vsel %vm1003_vm7, %v249_v16, %v257_v31 }
 0x223   : > { %v270_v33 = vmax.f32 %v243_v11, %v266_v32 }
 0x225   : > { %285 = vrot.lane.b32.xlu1 %v271_v30, %s787_s4  ;;  %275 = vrot.lane.b32.xlu2 %v270_v33, %s786_s3 }
 0x226   : > { %283 = vrot.lane.b32.xlu0 %v270_v33, %s787_s4 }
 0x229   : > { %v162_v36 = vpop.permute.xlu0 %161 }
 0x22a   : > { %vm164_vm8 = vcmp.eq.s32.totalorder %v162_v36, %v163_v35 }
 0x22b   : > { %v289_v37 = vsel %vm164_vm8, 1, %v780_v10 }
 0x22c   : > { %v290_v39 = vperm.slane %v289_v37, 0 }
 0x22d   : > { %281 = vrot.lane.b32.xlu2 %v269_v22, %s787_s4 }
 0x22e   : > { %vm1025_vm9 = vcmp.eq.s32.totalorder %v290_v39, 1 }
 0x235   : > { %287 = vrot.lane.b32.xlu2 %v272_v27, %s787_s4 }
 0x27f   : > { %v276_v38 = vpop.permute.xlu2 %275 }
 0x287   : > { %v274_v41 = vpop.permute.xlu1 %273  ;;  %v282_v42 = vpop.permute.xlu2 %281 }
 0x288   : > { %v292_v43 = vsel %vm1025_vm9, %v274_v41, %v282_v42 }
 0x289   : > { %v296_v44 = vmax.f32 %v269_v22, %v292_v43 }
 0x28b   : > { %v300_v45 = vsub.f32 %v905_v4, %v296_v44 }
 0x28d   : > { %v304_v46 = vmul.f32 1.442695, %v300_v45 }
 0x28f   : > { %661 = vpow2.f32 %v304_v46  ;;  %v280_v1 = vpop.permute.xlu1 %279  ;;  %v288_v47 = vpop.permute.xlu2 %287 }
 0x290   : > { %v295_v10 = vsel %vm1025_vm9, %v280_v1, %v288_v47  ;;  %v278_v50 = vpop.permute.xlu0 %277 }
 0x291   : > { %v299_v48 = vmax.f32 %v272_v27, %v295_v10 }
 0x293   : > { %v303_v49 = vsub.f32 %v903_v3, %v299_v48 }
 0x295   : > { %v1035_v51 = vpop.eup %661  ;;  %v310_v52 = vmul.f32 1.442695, %v303_v49 }
 0x296   : > { %312 = vrot.lane.b32.xlu0 %v1035_v51, %s777_s25 }
 0x297   : > { %663 = vpow2.f32 %v310_v52  ;;  %v286_v53 = vpop.permute.xlu1 %285 }
 0x298   : > { %v294_v4 = vsel %vm1025_vm9, %v278_v50, %v286_v53  ;;  %v284_v57 = vpop.permute.xlu0 %283 }
 0x299   : > { %v298_v54 = vmax.f32 %v271_v30, %v294_v4  ;;  %v293_v58 = vsel %vm1025_vm9, %v276_v38, %v284_v57 }
 0x29a   : > { %v297_v60 = vmax.f32 %v270_v33, %v293_v58 }
 0x29b   : > { %v302_v56 = vsub.f32 %v911_v5, %v298_v54 }
 0x29c   : > { %v301_v61 = vsub.f32 %v899_v2, %v297_v60 }
 0x29d   : > { %v1044_v3 = vpop.eup %663  ;;  %v308_v59 = vmul.f32 1.442695, %v302_v56 }
 0x29e   : > { %318 = vrot.lane.b32.xlu0 %v1044_v3, %s777_s25  ;;  %v306_v62 = vmul.f32 1.442695, %v301_v61 }
 0x29f   : > { %665 = vpow2.f32 %v308_v59 }
 0x2a0   : > { %667 = vpow2.f32 %v306_v62 }
 0x2a5   : > { %v1049_v63 = vpop.eup %665 }
 0x2a6   : > { %324 = vrot.lane.b32.xlu0 %v1049_v63, %s778_s17  ;;  %316 = vrot.lane.b32.xlu2 %v1049_v63, %s777_s25  ;;  %v1055_v5 = vpop.eup %667 }
 0x2a7   : > { %314 = vrot.lane.b32.xlu1 %v1055_v5, %s777_s25 }
 0x2ae   : > { %322 = vrot.lane.b32.xlu2 %v1055_v5, %s778_s17 }
 0x2af   : > { %320 = vrot.lane.b32.xlu1 %v1035_v51, %s778_s17 }
 0x2b7   : > { %326 = vrot.lane.b32.xlu1 %v1044_v3, %s778_s17 }
 0x300   : > { %v317_v6 = vpop.permute.xlu2 %316 }
 0x308   : > { %v313_v2 = vpop.permute.xlu0 %312  ;;  %v323_v11 = vpop.permute.xlu2 %322 }
 0x310   : > { %v319_v0 = vpop.permute.xlu0 %318 }
 0x318   : > { %v325_v7 = vpop.permute.xlu0 %324 }
 0x319   : > { %v330_v8 = vsel %vm927_vm1, %v317_v6, %v325_v7  ;;  %v315_v12 = vpop.permute.xlu1 %314 }
 0x31a   : > { %v334_v9 = vadd.f32 %v1049_v63, %v330_v8  ;;  %v329_v13 = vsel %vm927_vm1, %v315_v12, %v323_v11 }
 0x31b   : > { %v333_v15 = vadd.f32 %v1055_v5, %v329_v13 }
 0x31c   : > { %340 = vrot.lane.b32.xlu1 %v334_v9, %s779_s26 }
 0x31d   : > { %338 = vrot.lane.b32.xlu0 %v333_v15, %s779_s26 }
 0x321   : > { %v321_v16 = vpop.permute.xlu1 %320 }
 0x322   : > { %v328_v17 = vsel %vm927_vm1, %v313_v2, %v321_v16 }
 0x323   : > { %v332_v18 = vadd.f32 %v1035_v51, %v328_v17 }
 0x324   : > { %346 = vrot.lane.b32.xlu1 %v333_v15, %s781_s27 }
 0x325   : > { %344 = vrot.lane.b32.xlu0 %v332_v18, %s781_s27  ;;  %336 = vrot.lane.b32.xlu2 %v332_v18, %s779_s26 }
 0x329   : > { %v327_v20 = vpop.permute.xlu1 %326 }
 0x32a   : > { %v331_v21 = vsel %vm927_vm1, %v319_v0, %v327_v20 }
 0x32b   : > { %v335_v22 = vadd.f32 %v1044_v3, %v331_v21 }
 0x32d   : > { %350 = vrot.lane.b32.xlu0 %v335_v22, %s781_s27  ;;  %342 = vrot.lane.b32.xlu2 %v335_v22, %s779_s26  ;;  %s727_s26 = scalar_lea.hbm %s1189_s1, 64 }
 0x32e   : > { %p729_p1 = scmp.lt.s32.totalorder %s727_s26, %s723_s24 }
 0x330   : > { %p730_p3 = por %p729_p1, %p728_p0 }
 0x332   : > { %p731_p4 = pnand %p730_p3, %p726_p13 }
 0x335   : > { %348 = vrot.lane.b32.xlu2 %v334_v9, %s781_s27 }
 0x37f   : > { %v337_v23 = vpop.permute.xlu2 %336 }
 0x387   : > { %v343_v24 = vpop.permute.xlu2 %342 }
 0x38e   : > { %v341_v25 = vpop.permute.xlu1 %340 }
 0x38f   : > { %v349_v26 = vpop.permute.xlu2 %348  ;;  %v339_v27 = vpop.permute.xlu0 %338 }
 0x390   : > { %v354_v28 = vsel %vm955_vm3, %v341_v25, %v349_v26 }
 0x391   : > { %v358_v29 = vadd.f32 %v354_v28, %v334_v9 }
 0x393   : > { %364 = vrot.lane.b32.xlu0 %v358_v29, %s782_s28 }
 0x396   : > { %v347_v14 = vpop.permute.xlu1 %346 }
 0x397   : > { %v353_v30 = vsel %vm955_vm3, %v339_v27, %v347_v14  ;;  %v345_v32 = vpop.permute.xlu0 %344 }
 0x398   : > { %v357_v31 = vadd.f32 %v353_v30, %v333_v15  ;;  %v352_v33 = vsel %vm955_vm3, %v337_v23, %v345_v32 }
 0x399   : > { %v356_v35 = vadd.f32 %v352_v33, %v332_v18 }
 0x39a   : > { %362 = vrot.lane.b32.xlu2 %v357_v31, %s782_s28 }
 0x39b   : > { %370 = vrot.lane.b32.xlu0 %v357_v31, %s783_s29  ;;  %360 = vrot.lane.b32.xlu1 %v356_v35, %s782_s28 }
 0x39f   : > { %v351_v36 = vpop.permute.xlu0 %350 }
 0x3a0   : > { %v355_v37 = vsel %vm955_vm3, %v343_v24, %v351_v36 }
 0x3a1   : > { %v359_v38 = vadd.f32 %v355_v37, %v335_v22 }
 0x3a2   : > { %368 = vrot.lane.b32.xlu2 %v356_v35, %s783_s29 }
 0x3a3   : > { %366 = vrot.lane.b32.xlu1 %v359_v38, %s782_s28 }
 0x3aa   : > { %374 = vrot.lane.b32.xlu2 %v359_v38, %s783_s29 }
 0x3ab   : > { %372 = vrot.lane.b32.xlu1 %v358_v29, %s783_s29 }
 0x3f4   : > { %v363_v39 = vpop.permute.xlu2 %362 }
 0x3fc   : > { %v369_v42 = vpop.permute.xlu2 %368 }
 0x404   : > { %v375_v47 = vpop.permute.xlu2 %374 }
 0x405   : > { %v365_v41 = vpop.permute.xlu0 %364 }
 0x40d   : > { %v361_v43 = vpop.permute.xlu1 %360  ;;  %v371_v44 = vpop.permute.xlu0 %370 }
 0x40e   : > { %v376_v45 = vsel %vm979_vm5, %v361_v43, %v369_v42  ;;  %v377_v46 = vsel %vm979_vm5, %v363_v39, %v371_v44 }
 0x40f   : > { %v380_v34 = vadd.f32 %v376_v45, %v356_v35  ;;  %v381_v1 = vadd.f32 %v377_v46, %v357_v31 }
 0x411   : > { %384 = vrot.lane.b32.xlu0 %v380_v34, %s784_s30  ;;  %386 = vrot.lane.b32.xlu1 %v381_v1, %s784_s30 }
 0x415   : > { %v367_v10 = vpop.permute.xlu1 %366 }
 0x416   : > { %v379_v48 = vsel %vm979_vm5, %v367_v10, %v375_v47 }
 0x417   : > { %v383_v49 = vadd.f32 %v379_v48, %v359_v38 }
 0x419   : > { %390 = vrot.lane.b32.xlu0 %v383_v49, %s784_s30  ;;  %392 = vrot.lane.b32.xlu1 %v380_v34, %s785_s2 }
 0x41d   : > { %v373_v50 = vpop.permute.xlu1 %372 }
 0x41e   : > { %v378_v52 = vsel %vm979_vm5, %v365_v41, %v373_v50 }
 0x41f   : > { %v382_v53 = vadd.f32 %v378_v52, %v358_v29 }
 0x421   : > { %396 = vrot.lane.b32.xlu0 %v382_v53, %s785_s2  ;;  %388 = vrot.lane.b32.xlu2 %v382_v53, %s784_s30 }
 0x422   : > { %398 = vrot.lane.b32.xlu1 %v383_v49, %s785_s2 }
 0x429   : > { %394 = vrot.lane.b32.xlu2 %v381_v1, %s785_s2 }
 0x47b   : > { %v389_v4 = vpop.permute.xlu2 %388 }
 0x483   : > { %v395_v54 = vpop.permute.xlu2 %394  ;;  %v387_v56 = vpop.permute.xlu1 %386 }
 0x484   : > { %v401_v57 = vsel %vm1003_vm7, %v387_v56, %v395_v54  ;;  %v385_v58 = vpop.permute.xlu0 %384 }
 0x485   : > { %v405_v59 = vadd.f32 %v401_v57, %v381_v1 }
 0x487   : > { %410 = vrot.lane.b32.xlu0 %v405_v59, %s786_s3 }
 0x48b   : > { %v393_v55 = vpop.permute.xlu1 %392 }
 0x48c   : > { %v400_v60 = vsel %vm1003_vm7, %v385_v58, %v393_v55  ;;  %v391_v61 = vpop.permute.xlu0 %390 }
 0x48d   : > { %v404_v62 = vadd.f32 %v400_v60, %v380_v34 }
 0x48f   : > { %416 = vrot.lane.b32.xlu0 %v404_v62, %s787_s4  ;;  %408 = vrot.lane.b32.xlu2 %v404_v62, %s786_s3 }
 0x494   : > { %v399_v2 = vpop.permute.xlu1 %398  ;;  %v397_v0 = vpop.permute.xlu0 %396 }
 0x495   : > { %v403_v6 = vsel %vm1003_vm7, %v391_v61, %v399_v2  ;;  %v402_v7 = vsel %vm1003_vm7, %v389_v4, %v397_v0 }
 0x496   : > { %v407_v8 = vadd.f32 %v403_v6, %v383_v49  ;;  %v406_v9 = vadd.f32 %v402_v7, %v382_v53 }
 0x498   : > { %422 = vrot.lane.b32.xlu0 %v407_v8, %s787_s4  ;;  %414 = vrot.lane.b32.xlu2 %v407_v8, %s786_s3 }
 0x499   : > { %412 = vrot.lane.b32.xlu1 %v406_v9, %s786_s3 }
 0x4a0   : > { %420 = vrot.lane.b32.xlu2 %v406_v9, %s787_s4 }
 0x4a1   : > { %418 = vrot.lane.b32.xlu1 %v405_v59, %s787_s4 }
 0x4e9   : > { %v409_v11 = vpop.permute.xlu2 %408 }
 0x4f2   : > { %v415_v13 = vpop.permute.xlu2 %414 }
 0x4f9   : > { %v411_v12 = vpop.permute.xlu0 %410 }
 0x4fa   : > { %v421_v20 = vpop.permute.xlu2 %420 }
 0x501   : > { %v417_v15 = vpop.permute.xlu0 %416 }
 0x502   : > { %v424_v19 = vsel %vm1025_vm9, %v409_v11, %v417_v15 }
 0x503   : > { %v428_v16 = vadd.f32 %v424_v19, %v404_v62 }
 0x505   : > { %669 = vrcp.f32 %v428_v16  ;;  %v443_v28 = vand.u32 2147483648, %v428_v16  ;;  %v441_v14 = vand.u32 2147483647, %v428_v16  ;;  %vm437_vm11 = vweird.f32 %v428_v16 }
 0x507   : > { %v444_v31 = vor.u32 1.1754944e-38, %v443_v28  ;;  %vm442_vm13 = vcmp.eq.f32.partialorder %v441_v14, 8.507059e+37 }
 0x50a   : > { %v423_v17 = vpop.permute.xlu0 %422 }
 0x50b   : > { %v670_v18 = vpop.eup %669  ;;  %v413_v21 = vpop.permute.xlu1 %412  ;;  %v427_v22 = vsel %vm1025_vm9, %v415_v13, %v423_v17 }
 0x50c   : > { %v433_v23 = vmul.f32 %v670_v18, %v428_v16  ;;  %v426_v24 = vsel %vm1025_vm9, %v413_v21, %v421_v20  ;;  %v431_v25 = vadd.f32 %v427_v22, %v407_v8  ;;  %vm438_vm10 = vweird.f32 %v670_v18 }
 0x50d   : > { %v430_v26 = vadd.f32 %v426_v24, %v406_v9  ;;  %vm439_vm12 = vmor %vm437_vm11, %vm438_vm10 }
 0x50e   : > { %v434_v27 = vsub.f32 1.0, %v433_v23  ;;  %671 = vrcp.f32 %v431_v25  ;;  %v485_v46 = vand.u32 2147483648, %v431_v25  ;;  %v483_v40 = vand.u32 2147483647, %v431_v25 }
 0x50f   : > { %673 = vrcp.f32 %v430_v26  ;;  %v471_v34 = vand.u32 2147483648, %v430_v26  ;;  %v469_v10 = vand.u32 2147483647, %v430_v26  ;;  %vm479_vm0 = vweird.f32 %v431_v25 }
 0x510   : > { %v435_v29 = vmul.f32 %v670_v18, %v434_v27  ;;  %vm465_vm1 = vweird.f32 %v430_v26  ;;  %v486_v49 = vor.u32 1.1754944e-38, %v485_v46  ;;  %vm484_vm4 = vcmp.eq.f32.partialorder %v483_v40, 8.507059e+37 }
 0x511   : > { %v472_v52 = vor.u32 1.1754944e-38, %v471_v34  ;;  %vm470_vm5 = vcmp.eq.f32.partialorder %v469_v10, 8.507059e+37 }
 0x512   : > { %v436_v30 = vadd.f32 %v670_v18, %v435_v29 }
 0x513   : > { %v419_v32 = vpop.permute.xlu1 %418 }
 0x514   : > { %v672_v33 = vpop.eup %671  ;;  %v440_v35 = vsel %vm439_vm12, %v670_v18, %v436_v30  ;;  %v425_v36 = vsel %vm1025_vm9, %v411_v12, %v419_v32 }
 0x515   : > { %v674_v37 = vpop.eup %673  ;;  %v445_v38 = vsel %vm442_vm13, %v444_v31, %v440_v35  ;;  %v475_v39 = vmul.f32 %v672_v33, %v431_v25  ;;  %v429_v41 = vadd.f32 %v425_v36, %v405_v59  ;;  %vm480_vm14 = vweird.f32 %v672_v33 }
 0x516   : > { %v488_v42 = vmul.f32 %v1035_v51, %v445_v38  ;;  %v461_v43 = vmul.f32 %v674_v37, %v430_v26  ;;  %vm466_vm15 = vweird.f32 %v674_v37  ;;  %vm481_vm2 = vmor %vm479_vm0, %vm480_vm14 }
 0x517   : > { %v476_v44 = vsub.f32 1.0, %v475_v39  ;;  %675 = vrcp.f32 %v429_v41  ;;  %vm467_vm3 = vmor %vm465_vm1, %vm466_vm15  ;;  %v457_v60 = vand.u32 2147483648, %v429_v41  ;;  %v455_v62 = vand.u32 2147483647, %v429_v41 }
 0x518   : > { %492 = vst [vmem:[%s1144_s5] sm:$0xff] %v488_v42  ;;  %v462_v45 = vsub.f32 1.0, %v461_v43  ;;  %vm451_vm7 = vweird.f32 %v429_v41 }
 0x519   : > { %v477_v1 = vmul.f32 %v672_v33, %v476_v44  ;;  %vm456_vm9 = vcmp.eq.f32.partialorder %v455_v62, 8.507059e+37 }
 0x51a   : > { %v463_v47 = vmul.f32 %v674_v37, %v462_v45 }
 0x51b   : > { %v478_v48 = vadd.f32 %v672_v33, %v477_v1 }
 0x51c   : > { %v464_v51 = vadd.f32 %v674_v37, %v463_v47 }
 0x51d   : > { %v676_v50 = vpop.eup %675  ;;  %v482_v53 = vsel %vm481_vm2, %v672_v33, %v478_v48 }
 0x51e   : > { %v468_v4 = vsel %vm467_vm3, %v674_v37, %v464_v51  ;;  %v487_v54 = vsel %vm484_vm4, %v486_v49, %v482_v53  ;;  %v447_v56 = vmul.f32 %v676_v50, %v429_v41  ;;  %vm452_vm6 = vweird.f32 %v676_v50 }
 0x51f   : > { %v473_v57 = vsel %vm470_vm5, %v472_v52, %v468_v4  ;;  %v491_v58 = vmul.f32 %v1044_v3, %v487_v54  ;;  %vm453_vm8 = vmor %vm451_vm7, %vm452_vm6  ;;  %v458_v3 = vor.u32 1.1754944e-38, %v457_v60 }
 0x520   : > { %v490_v59 = vmul.f32 %v1049_v63, %v473_v57  ;;  %v448_v55 = vsub.f32 1.0, %v447_v56 }
 0x521   : > { %495 = vst [vmem:[%s1144_s5 + $0x18] sm:$0xff] %v491_v58 }
 0x522   : > { %494 = vst [vmem:[%s1144_s5 + $0x10] sm:$0xff] %v490_v59  ;;  %v449_v61 = vmul.f32 %v676_v50, %v448_v55 }
 0x524   : > { %v450_v2 = vadd.f32 %v676_v50, %v449_v61 }
 0x526   : > { %v454_v63 = vsel %vm453_vm8, %v676_v50, %v450_v2 }
 0x527   : > { %v459_v0 = vsel %vm456_vm9, %v458_v3, %v454_v63 }
 0x528   : > { %v489_v6 = vmul.f32 %v1055_v5, %v459_v0 }
 0x52a   : > { %493 = vst [vmem:[%s1144_s5 + $0x8] sm:$0xff] %v489_v6 }
 0x52b   : > { %734 = shalt.err (!%p731_p4)
}
 0x52c   : > { %s788_s21 = smov 128  }
 0x52d   : > { %603 = dma.vmem_to_hbm [thread:$0]  (%p849_p11), %s510_s20, 512, %s512_s10, %s497_s22, %s788_s21, %s788_s21, %s785_s2  }
 0x52e PF: > { %s526_s29 = sand.u32 1, %s761_s6   ;;  %p1205_p7 = scmp.ge.s32.totalorder %s773_s9, 2 }
 0x52f   : > { %s527_s30 = scalar_lea.sflag [#allocation4], %s526_s29 }
 0x530   : > { %p610_p5 = pnand %p1205_p7, %p853_p12 }
 0x532   : > { %p611_p8 = pneg %p610_p5 }
 0x534   : > { %756 = dma.done.wait (%p611_p8), %s527_s30, 512  }
 0x535   : > { %758 = vsyncadd (%p611_p8), %s527_s30, 4294966784  ;;  %p14_p10 = scmp.ge.s32.totalorder %s824_s12, 4   ;;  %s1206_s6 = smov %s765_s7 }
 0x536   : > { %s1207_s7 = smov %s769_s8  ;;  %s1208_s8 = smov %s836_s15 }
 0x537   : > { %s1209_s9 = smov %s824_s12  ;;  %16 = sbr.rel (!%p14_p10) target bundleno = 5 (0x5), region = 69 }
 0x53c   :  { %533 = vsyncpa [#allocation3], 1 }
 0x53d   :  { %535 = vsyncpa [#allocation3 + $0x1], 1 }
 0x53e   :  { %536 = vsyncpa [#allocation4], 1 }
 0x53f   :  { %538 = vsyncpa [#allocation4 + $0x1], 1 }

</bundles_post_ra>
